<compile_context>
chip_gen: v7x
topology: tpu7x:2x2x1
jax: 0.10.0
libtpu: 0.0.40
codegen_flags: <defaults>
</compile_context>

<pallas_src>
from functools import partial

import jax
import jax.numpy as jnp
from jax.experimental import pallas as pl
from jax.experimental.pallas import tpu as pltpu

ALPHA_RELU = 0.15
BN_EPS = 1e-5


def _round_up(x, m):
    return (x + m - 1) // m * m


def _vmem_limit_bytes():
    """Per-generation scoped-VMEM limit (v5e/v6e: 128 MiB phys, v7x: 64 MiB/TC)."""
    try:
        cap = pltpu.get_tpu_info().vmem_capacity_bytes
    except Exception:
        cap = 64 * 1024 * 1024          # conservative default (v7x per-TC)
    return min(int(cap * 3 // 4), 100 * 1024 * 1024)


def _tile_divisors(dim):
    """128-multiple divisors of `dim` (dim is itself a multiple of 128), descending."""
    return [t for t in range(dim, 0, -128) if dim % t == 0]


def _footprint(n, tk, tn, x_isz, w_isz):
    """Double-buffered per-step VMEM bytes for a (tk, tn) schedule with full batch N."""
    return (2 * n * tk * x_isz          # x block
            + 2 * tk * tn * w_isz       # W block
            + 2 * n * tn * 4            # f32 output block (resident accumulator)
            + 4 * tn * 4)               # gamma + beta blocks


def _select_tiles(n, in_f, out_pad, x_isz, w_isz, budget):
    """Pick (tk, tn, k_steps).  Prefer tk == in_f (K collapsed: x resident,
    DMA'd once, no K padding); otherwise a 128-padded K-tiled schedule.
    Returns None if even minimal tiles overflow the budget."""
    tn_cands = _tile_divisors(out_pad)
    # Prefer >= 2 output tiles so the "parallel" axis can shard across the two
    # TensorCores on v7x (harmless on single-TC v5e/v6e).
    if out_pad >= 256:
        two = [t for t in tn_cands if out_pad // t >= 2]
        tn_cands = two if two else tn_cands

    # 1) Collapsed-K schedule (tk = in_f exactly; full-dim block, no padding).
    for tn in tn_cands:
        if _footprint(n, in_f, tn, x_isz, w_isz) <= budget:
            return in_f, tn, 1

    # 2) K-tiled schedule: K padded to a 128 multiple, reduction axis last.
    k_pad = _round_up(in_f, 128)
    for tk in _tile_divisors(k_pad):
        for tn in tn_cands:
            if _footprint(n, tk, tn, x_isz, w_isz) <= budget:
                return tk, tn, k_pad // tk
    return None


def _epilogue(y, gamma_ref, beta_ref, o_ref, inv_n):
    """BatchNorm1d (training-mode biased batch stats) + LeakyReLU, fused affine."""
    s = jnp.sum(y, axis=0, keepdims=True)               # (1, tn)
    ss = jnp.sum(y * y, axis=0, keepdims=True)          # (1, tn)
    mean = s * inv_n
    var = jnp.maximum(ss * inv_n - mean * mean, 0.0)    # clamp: no rsqrt(neg) NaN
    scale = gamma_ref[...] * jax.lax.rsqrt(var + BN_EPS)
    shift = beta_ref[...] - mean * scale
    z = y * scale + shift                               # 2 VALU ops on the big tile
    o_ref[...] = jnp.where(z >= 0, z, ALPHA_RELU * z).astype(o_ref.dtype)


def _linear_bn_lrelu_kernel(x_ref, w_ref, gamma_ref, beta_ref, o_ref, *,
                            inv_n, k_steps):
    # Cast activations to the MXU operand dtype in-VMEM (cheap VPU cast hidden
    # under the matmul) so the wrapper never spends an HBM pass on x.astype().
    contrib = jnp.dot(x_ref[...].astype(w_ref.dtype), w_ref[...],
                      preferred_element_type=jnp.float32)

    if k_steps == 1:
        # K collapsed: no accumulator round-trip at all.
        _epilogue(contrib, gamma_ref, beta_ref, o_ref, inv_n)
    else:
        k = pl.program_id(1)
        last = k_steps - 1

        @pl.when(k == 0)
        def _():
            # Accumulate directly into the resident f32 output block.
            o_ref[...] = contrib

        @pl.when(jnp.logical_and(k > 0, k < last))
        def _():
            o_ref[...] += contrib

        @pl.when(k == last)
        def _():
            # Fuse the final partial sum into the epilogue read (saves one
            # full (N, tn) store+load pass vs. "+= then finalize").
            _epilogue(o_ref[...] + contrib, gamma_ref, beta_ref, o_ref, inv_n)


def prepare_params(weight, gamma, beta, *, matmul_dtype=jnp.bfloat16):
    """One-time parameter transform (setup-time, NOT per forward call).

    weight: (out_features, in_features), PyTorch nn.Linear layout.
    Returns W^T with the OUT dim zero-padded to a 128 multiple (lane-dense
    stores, (8,128)-legal tiles).  K is left unpadded so the common collapsed-K
    schedule needs no activation padding either.  bf16 weights by default:
    all three MXU generations are bf16-native and it halves W DMA bytes.
    The Linear bias is omitted: BatchNorm's batch-mean subtraction cancels a
    per-feature additive bias exactly.
    """
    out_f, in_f = weight.shape
    out_pad = _round_up(out_f, 128)
    w_t = jnp.pad(weight.T.astype(jnp.float32), ((0, 0), (0, out_pad - out_f)))
    w_t = w_t.astype(matmul_dtype)
    g = jnp.pad(gamma.astype(jnp.float32), (0, out_pad - out_f)).reshape(1, out_pad)
    b = jnp.pad(beta.astype(jnp.float32), (0, out_pad - out_f)).reshape(1, out_pad)
    return w_t, g, b


def linear_layer_forward(x, w_p, gamma_p, beta_p, *, out_features,
                         tile_budget_bytes=None):
    """x: (N, in_features).  w_p/gamma_p/beta_p: outputs of prepare_params."""
    n, in_f = x.shape
    k_w, out_pad = w_p.shape
    assert k_w == in_f, "weight K dim must match x"

    vmem_limit = _vmem_limit_bytes()
    budget = tile_budget_bytes if tile_budget_bytes is not None \
        else int(vmem_limit * 0.85)

    sel = _select_tiles(n, in_f, out_pad,
                        jnp.dtype(x.dtype).itemsize,
                        jnp.dtype(w_p.dtype).itemsize, budget)
    if sel is None:
        # TODO(synk): add an N-tiled schedule (per-feature sum/sumsq carried in a
        # small resident scratch + second normalize pass) for very large batches;
        # until then, fall back to unfused XLA so huge N still runs.
        y = jnp.dot(x.astype(w_p.dtype), w_p, preferred_element_type=jnp.float32)
        mean = y.mean(axis=0, keepdims=True)
        var = jnp.maximum((y * y).mean(axis=0, keepdims=True) - mean * mean, 0.0)
        z = (y - mean) * jax.lax.rsqrt(var + BN_EPS) * gamma_p + beta_p
        out = jnp.where(z >= 0, z, ALPHA_RELU * z)
        return out[:, :out_features] if out_features != out_pad else out

    tk, tn, k_steps = sel
    w = w_p
    if k_steps > 1:
        # K-tiled fallback path: pad K on both operands so x tiles are 128-lane
        # legal.  (Production callers that hit this path should pre-pad W at
        # setup; the common collapsed-K path never pads.)
        k_pad = tk * k_steps
        if in_f != k_pad:
            x = jnp.pad(x, ((0, 0), (0, k_pad - in_f)))
            w = jnp.pad(w_p, ((0, k_pad - in_f), (0, 0)))

    grid = (out_pad // tn, k_steps)
    kernel = partial(_linear_bn_lrelu_kernel, inv_n=1.0 / n, k_steps=k_steps)

    x_isz = jnp.dtype(x.dtype).itemsize
    w_isz = jnp.dtype(w.dtype).itemsize
    cost = pl.CostEstimate(
        flops=2 * n * tk * k_steps * out_pad,
        transcendentals=0,
        bytes_accessed=(n * tk * k_steps * x_isz          # x (read once: resident)
                        + tk * k_steps * out_pad * w_isz  # W
                        + n * out_pad * 4                 # out
                        + 2 * out_pad * 4),               # gamma, beta
    )

    out = pl.pallas_call(
        kernel,
        out_shape=jax.ShapeDtypeStruct((n, out_pad), jnp.float32),
        grid_spec=pltpu.PrefetchScalarGridSpec(
            num_scalar_prefetch=0,
            grid=grid,
            in_specs=[
                pl.BlockSpec((n, tk), lambda j, k: (0, k)),    # x (full batch / block)
                pl.BlockSpec((tk, tn), lambda j, k: (k, j)),   # W^T (K, OUT)
                pl.BlockSpec((1, tn), lambda j, k: (0, j)),    # gamma
                pl.BlockSpec((1, tn), lambda j, k: (0, j)),    # beta
            ],
            out_specs=pl.BlockSpec((n, tn), lambda j, k: (0, j)),
        ),
        compiler_params=pltpu.CompilerParams(
            dimension_semantics=("parallel", "arbitrary"),
            vmem_limit_bytes=vmem_limit,
        ),
        cost_estimate=cost,
    )(x, w, gamma_p, beta_p)

    # Slice only when out_features is not already 128-aligned (the slice is an
    # extra HBM pass; keep out_features 128-aligned in production to skip it).
    return out[:, :out_features] if out_features != out_pad else out


if __name__ == "__main__":
    key = jax.random.PRNGKey(0)
    kx, kw, kb = jax.random.split(key, 3)

    N, IN_F, OUT_F = 8, 32, 64  # small demo shapes

    # Parameter init mimicking nn.Linear / nn.BatchNorm1d defaults.
    bound = 1.0 / (IN_F ** 0.5)
    weight = jax.random.uniform(kw, (OUT_F, IN_F), jnp.float32, -bound, bound)
    bias = jax.random.uniform(kb, (OUT_F,), jnp.float32, -bound, bound)
    gamma = jnp.ones((OUT_F,), jnp.float32)
    beta = jnp.zeros((OUT_F,), jnp.float32)
    x = jax.random.normal(kx, (N, IN_F), jnp.float32)

    def torch_ref(x, weight, bias, gamma, beta):
        # Pure-JAX reference (includes the Linear bias; BatchNorm's mean
        # subtraction cancels it exactly, which is why the kernel omits it).
        y = x @ weight.T + bias
        mean = y.mean(axis=0, keepdims=True)
        var = ((y - mean) ** 2).mean(axis=0, keepdims=True)
        y = (y - mean) / jnp.sqrt(var + BN_EPS) * gamma + beta
        return jnp.where(y >= 0, y, ALPHA_RELU * y)

    y_ref = torch_ref(x, weight, bias, gamma, beta)

    # --- default path: bf16 MXU operands, f32 accumulation + f32 epilogue ---
    w_b, g_b, b_b = prepare_params(weight, gamma, beta)      # bf16 default
    out_bf16 = linear_layer_forward(x, w_b, g_b, b_b, out_features=OUT_F)
    jax.block_until_ready(out_bf16)
    assert out_bf16.shape == (N, OUT_F)
    assert jnp.allclose(out_bf16, y_ref, atol=5e-2, rtol=5e-2), "bf16 path mismatch"

    # --- f32-operand strict-parity path ---
    w_f, g_f, b_f = prepare_params(weight, gamma, beta, matmul_dtype=jnp.float32)
    out_f32 = linear_layer_forward(x, w_f, g_f, b_f, out_features=OUT_F)
    jax.block_until_ready(out_f32)
    assert jnp.allclose(out_f32, y_ref, atol=1e-4, rtol=1e-4), "f32 path mismatch"

    # --- exercise the K-tiled multi-step schedule (forced via a tiny budget) ---
    IN2, OUT2 = 256, 256
    w2 = jax.random.uniform(kw, (OUT2, IN2), jnp.float32, -1 / 16, 1 / 16)
    b2 = jax.random.uniform(kb, (OUT2,), jnp.float32, -1 / 16, 1 / 16)
    g2 = jnp.ones((OUT2,), jnp.float32)
    be2 = jnp.zeros((OUT2,), jnp.float32)
    x2 = jax.random.normal(kx, (N, IN2), jnp.float32)
    y2_ref = torch_ref(x2, w2, b2, g2, be2)
    w2_p, g2_p, be2_p = prepare_params(w2, g2, be2, matmul_dtype=jnp.float32)
    out2 = linear_layer_forward(x2, w2_p, g2_p, be2_p, out_features=OUT2,
                                tile_budget_bytes=200_000)   # forces k_steps > 1
    jax.block_until_ready(out2)
    assert out2.shape == (N, OUT2)
    assert jnp.allclose(out2, y2_ref, atol=1e-4, rtol=1e-4), "K-tiled path mismatch"

    print("KERNEL_OK")
</pallas_src>

<mosaic_0001>
module attributes {stable_mosaic.version = 11 : i64} {
  func.func @_linear_bn_lrelu_kernel(%arg0: i32, %arg1: i32, %arg2: memref<8x32xf32, #tpu.memory_space<vmem>>, %arg3: memref<32x128xbf16, #tpu.memory_space<vmem>>, %arg4: memref<1x128xf32, #tpu.memory_space<vmem>>, %arg5: memref<1x128xf32, #tpu.memory_space<vmem>>, %arg6: memref<8x128xf32, #tpu.memory_space<vmem>>) attributes {dimension_semantics = [#tpu.dimension_semantics<parallel>, #tpu.dimension_semantics<arbitrary>], iteration_bounds = array<i64: 1, 1>, scalar_prefetch = 0 : i64, scratch_operands = 0 : i64, tpu.core_type = #tpu.core_type<tc>, window_params = [{transform_indices = @transform_0, window_bounds = array<i64: 8, 32>}, {transform_indices = @transform_1, window_bounds = array<i64: 32, 128>}, {transform_indices = @transform_2, window_bounds = array<i64: 1, 128>}, {transform_indices = @transform_3, window_bounds = array<i64: 1, 128>}, {transform_indices = @transform_4, window_bounds = array<i64: 8, 128>}]} {
    %c0 = arith.constant 0 : index
    %c0_0 = arith.constant 0 : index
    %0 = vector.load %arg2[%c0, %c0_0] : memref<8x32xf32, #tpu.memory_space<vmem>>, vector<8x32xf32>
    %1 = arith.truncf %0 : vector<8x32xf32> to vector<8x32xbf16>
    %c0_1 = arith.constant 0 : index
    %c0_2 = arith.constant 0 : index
    %2 = vector.load %arg3[%c0_1, %c0_2] : memref<32x128xbf16, #tpu.memory_space<vmem>>, vector<32x128xbf16>
    %cst = arith.constant dense<0.000000e+00> : vector<8x128xf32>
    %3 = tpu.matmul %1, %2, %cst {dimension_numbers = #tpu.dot_dimension_numbers<[1], [0], [0], [1], [0, 0, 1, 1], [], []>} : vector<8x32xbf16>, vector<32x128xbf16>, vector<8x128xf32> -> vector<8x128xf32>
    %cst_3 = arith.constant dense<0.000000e+00> : vector<128xf32>
    %4 = vector.multi_reduction <add>, %3, %cst_3 [0] : vector<8x128xf32> to vector<128xf32>
    %5 = vector.shape_cast %4 : vector<128xf32> to vector<1x128xf32>
    %6 = arith.mulf %3, %3 : vector<8x128xf32>
    %cst_4 = arith.constant dense<0.000000e+00> : vector<128xf32>
    %7 = vector.multi_reduction <add>, %6, %cst_4 [0] : vector<8x128xf32> to vector<128xf32>
    %8 = vector.shape_cast %7 : vector<128xf32> to vector<1x128xf32>
    %cst_5 = arith.constant 1.250000e-01 : f32
    %9 = vector.broadcast %cst_5 : f32 to vector<1x128xf32>
    %10 = arith.mulf %5, %9 : vector<1x128xf32>
    %cst_6 = arith.constant 1.250000e-01 : f32
    %11 = vector.broadcast %cst_6 : f32 to vector<1x128xf32>
    %12 = arith.mulf %8, %11 : vector<1x128xf32>
    %13 = arith.mulf %10, %10 : vector<1x128xf32>
    %14 = arith.subf %12, %13 : vector<1x128xf32>
    %cst_7 = arith.constant 0.000000e+00 : f32
    %15 = vector.broadcast %cst_7 : f32 to vector<1x128xf32>
    %16 = arith.maximumf %14, %15 : vector<1x128xf32>
    %c0_8 = arith.constant 0 : index
    %c0_9 = arith.constant 0 : index
    %17 = vector.load %arg4[%c0_8, %c0_9] : memref<1x128xf32, #tpu.memory_space<vmem>>, vector<1x128xf32>
    %cst_10 = arith.constant 9.99999974E-6 : f32
    %18 = vector.broadcast %cst_10 : f32 to vector<1x128xf32>
    %19 = arith.addf %16, %18 : vector<1x128xf32>
    %20 = math.rsqrt %19 : vector<1x128xf32>
    %21 = arith.mulf %17, %20 : vector<1x128xf32>
    %c0_11 = arith.constant 0 : index
    %c0_12 = arith.constant 0 : index
    %22 = vector.load %arg5[%c0_11, %c0_12] : memref<1x128xf32, #tpu.memory_space<vmem>>, vector<1x128xf32>
    %23 = arith.mulf %10, %21 : vector<1x128xf32>
    %24 = arith.subf %22, %23 : vector<1x128xf32>
    %25 = vector.broadcast %21 : vector<1x128xf32> to vector<8x128xf32>
    %26 = arith.mulf %3, %25 : vector<8x128xf32>
    %27 = vector.broadcast %24 : vector<1x128xf32> to vector<8x128xf32>
    %28 = arith.addf %26, %27 : vector<8x128xf32>
    %cst_13 = arith.constant 0.000000e+00 : f32
    %29 = vector.broadcast %cst_13 : f32 to vector<8x128xf32>
    %30 = arith.cmpf oge, %28, %29 : vector<8x128xf32>
    %cst_14 = arith.constant 1.500000e-01 : f32
    %31 = vector.broadcast %cst_14 : f32 to vector<8x128xf32>
    %32 = arith.mulf %31, %28 : vector<8x128xf32>
    %33 = arith.select %30, %28, %32 : vector<8x128xi1>, vector<8x128xf32>
    %c0_15 = arith.constant 0 : index
    %c0_16 = arith.constant 0 : index
    %34 = vector.load %arg6[%c0_15, %c0_16] : memref<8x128xf32, #tpu.memory_space<vmem>>, vector<8x128xf32>
    tpu.vector_store %arg6[%c0_15, %c0_16], %33 {strides = array<i32>} : memref<8x128xf32, #tpu.memory_space<vmem>>, vector<8x128xf32>,
    return
  }
  func.func @transform_0(%arg0: i32, %arg1: i32) -> (i32, i32) {
    %c0_i32 = arith.constant 0 : i32
    %c0_i32_0 = arith.constant 0 : i32
    return %c0_i32, %arg1 : i32, i32
  }
  func.func @transform_1(%arg0: i32, %arg1: i32) -> (i32, i32) {
    %c0_i32 = arith.constant 0 : i32
    return %arg1, %arg0 : i32, i32
  }
  func.func @transform_2(%arg0: i32, %arg1: i32) -> (i32, i32) {
    %c0_i32 = arith.constant 0 : i32
    %c0_i32_0 = arith.constant 0 : i32
    return %c0_i32, %arg0 : i32, i32
  }
  func.func @transform_3(%arg0: i32, %arg1: i32) -> (i32, i32) {
    %c0_i32 = arith.constant 0 : i32
    %c0_i32_0 = arith.constant 0 : i32
    return %c0_i32, %arg0 : i32, i32
  }
  func.func @transform_4(%arg0: i32, %arg1: i32) -> (i32, i32) {
    %c0_i32 = arith.constant 0 : i32
    %c0_i32_0 = arith.constant 0 : i32
    return %c0_i32, %arg0 : i32, i32
  }
}

</mosaic_0001>

<bundles_post_ra>
// kernel: tpu_custom_call.1
= control target key start
LH: loop header
LB: loop body
LE: loop exit
PB: predicated region body
PF: predicated region fallthrough
CT: control target
= control target key end

     0   :  { %9 = vsyncpa [#allocation3], 0  ;;  %s344_s0 = inlined_call_operand.hbm [shape: f32[8,32], index: 0, kind: input, shape index: {}]   ;;  %s345_s1 = inlined_call_operand.hbm [shape: bf16[32,128], index: 1, kind: input, shape index: {}]   ;;  %s346_s2 = inlined_call_operand.vmem [shape: f32[1,128], index: 2, kind: input, shape index: {}]   ;;  %s347_s3 = inlined_call_operand.vmem [shape: f32[1,128], index: 3, kind: input, shape index: {}]   ;;  %s348_s4 = inlined_call_operand.hbm [shape: f32[8,128], index: 4, kind: output, shape index: {}]  }
   0x1   :  { %10 = vsyncpa [#allocation6], 0 }
   0x2   :  { %11 = vsyncpa [#allocation4], 0  ;;  %s263_s15 = smov [#allocation2]   ;;  %s264_s17 = smov [#allocation5]  }
   0x3   :  { %s18_s16 = sshll.u32 %s263_s15, 4  ;;  %s27_s18 = sshll.u32 %s264_s17, 4  ;;  %s19_s16 = int_to_ptr.vmem [resolvable:$true] %s18_s16  ;;  %s295_s18 = int_to_ptr.vmem [resolvable:$true] %s27_s18 }
   0x4   :  { %s191_s21 = scalar_lea.hbm %s344_s0, 128 }
   0x5   :  { %p192_p0 = scmp.ne.s32.totalorder %s344_s0, %s191_s21  ;;  %p195_p1 = scmp.lt.u32.totalorder %s191_s21, %s344_s0 }
   0x7   :  { %p197_p2 = pnand %p195_p1, %p192_p0 }
   0x9   :  { %200 = shalt.err (!%p197_p2)
}
   0xa   :  { %s201_s26 = scalar_lea.vmem %s19_s16, 128  ;;  %p206_p4 = scmp.lt.s32.totalorder %s19_s16, %s19_s16 }
   0xb   :  { %p202_p3 = scmp.ne.s32.totalorder %s19_s16, %s201_s26  ;;  %p207_p5 = scmp.lt.s32.totalorder %s201_s26, %s201_s26 }
   0xd   :  { %p208_p6 = por %p207_p5, %p206_p4 }
   0xf   :  { %p209_p7 = pnand %p208_p6, %p202_p3 }
  0x11   :  { %212 = shalt.err (!%p209_p7)
}
  0x12   :  { %21 = dma.hbm_to_vmem [thread:$0]  %s344_s0, 128, %s19_s16, [#allocation3]  }
  0x13   :  { %s213_s5 = scalar_lea.hbm %s345_s1, 256 }
  0x14   :  { %p214_p8 = scmp.ne.s32.totalorder %s345_s1, %s213_s5  ;;  %p217_p9 = scmp.lt.u32.totalorder %s213_s5, %s345_s1 }
  0x16   :  { %p219_p10 = pnand %p217_p9, %p214_p8 }
  0x18   :  { %222 = shalt.err (!%p219_p10)
}
  0x19   :  { %s223_s10 = scalar_lea.vmem %s295_s18, 256  ;;  %p228_p12 = scmp.lt.s32.totalorder %s295_s18, %s295_s18 }
  0x1a   :  { %p224_p11 = scmp.ne.s32.totalorder %s295_s18, %s223_s10  ;;  %p229_p13 = scmp.lt.s32.totalorder %s223_s10, %s223_s10 }
  0x1c   :  { %p230_p0 = por %p229_p13, %p228_p12 }
  0x1e   :  { %p231_p1 = pnand %p230_p0, %p224_p11 }
  0x20   :  { %234 = shalt.err (!%p231_p1)
}
  0x21   :  { %s265_s0 = smov 64   ;;  %s266_s11 = smov 4  }
  0x22   :  { %33 = dma.hbm_to_vmem [thread:$0]  %s345_s1, 256, %s295_s18, [#allocation6], %s265_s0, %s265_s0, %s266_s11  }
  0x23   :  { %257 = dma.done.wait [#allocation3], 128  }
  0x24   :  { %258 = vsyncadd [#allocation3], 4294967168 }
  0x25   :  { %259 = dma.done.wait [#allocation6], 256  }
  0x26   :  { %260 = vsyncadd [#allocation6], 4294967040  ;;  %v267_v0 = vmov 0.0   ;;  %vm268_vm0 = vmmov 0   ;;  %v187_v1 = vld [vmem:[#allocation5] sm:$0xff]   ;;  %v188_v2 = vld [vmem:[#allocation5 + $0x8] sm:$0xff]   ;;  %v133_v28 = vlaneseq }
  0x27   :  { %172 = vmatprep.subr.bf16.mxu0 %v267_v0  ;;  %176 = vmatprep.mubr.msk.bf16.mxu0 %vm268_vm0, %v267_v0  ;;  %v45_v3 = vld [vmem:[#allocation2] sm:$0xff]  ;;  %vm63_vm1 = vcmask 261120   ;;  %s269_s17 = smov [#allocation7]  }
  0x28   :  { %173 = vmatpush3.bf16.msra.mxu0 %v187_v1  ;;  %v46_v4 = vpack.c.bf16 %v45_v3, %v45_v3  ;;  %v134_v29 = vshrl.u32 %v133_v28, 7  ;;  %v125_v30 = vld [vmem:[%s346_s2] sm:$0x1]  ;;  %s156_s18 = sshll.u32 %s269_s17, 4  ;;  %s157_s18 = int_to_ptr.vmem [resolvable:$true] %s156_s18 }
  0x29   :  { %174 = vmatprep.subr.bf16.mxu0 %v267_v0  ;;  %v129_v34 = vld [vmem:[%s347_s3] sm:$0x1]  ;;  %s235_s2 = scalar_lea.vmem %s157_s18, 128  ;;  %p240_p3 = scmp.lt.s32.totalorder %s157_s18, %s157_s18 }
  0x2a   :  { %v135_v31 = vsub.s32 0, %v134_v29  ;;  %p236_p2 = scmp.ne.s32.totalorder %s157_s18, %s235_s2  ;;  %p241_p4 = scmp.lt.s32.totalorder %s235_s2, %s235_s2 }
  0x2c   :  { %175 = vmatpush3.bf16.msra.mxu0 %v188_v2  ;;  %p242_p5 = por %p241_p4, %p240_p3 }
  0x2e   :  { %p243_p6 = pnand %p242_p5, %p236_p2 }
  0x2f   :  { %177 = vmatmul.mubr.msk.bf16.vlgmr.msra.gmra.mrb[0].mxu0 %vm63_vm1, %v46_v4 }
 0x102   :  { %v101_v5 = vpop.f32.mrb[0].mxu0 }
 0x103   :  { %v107_v6 = vrot.slane %v101_v5, 4  ;;  %v113_v7 = vmul.f32 %v101_v5, %v101_v5  ;;  %v178_v8 = vpop.f32.mrb[1].mxu0 }
 0x104   :  { %v104_v9 = vpop.f32.mrb[2].mxu0 }
 0x105   :  { %v108_v10 = vadd.f32 %v107_v6, %v101_v5  ;;  %v114_v11 = vrot.slane %v113_v7, 4  ;;  %v179_v12 = vpop.f32.mrb[3].mxu0 }
 0x107   :  { %v109_v13 = vrot.slane %v108_v10, 2  ;;  %v115_v14 = vadd.f32 %v114_v11, %v113_v7 }
 0x109   :  { %v110_v15 = vadd.f32 %v109_v13, %v108_v10  ;;  %v116_v16 = vrot.slane %v115_v14, 2 }
 0x10b   :  { %v111_v17 = vrot.slane %v110_v15, 1  ;;  %v117_v18 = vadd.f32 %v116_v16, %v115_v14 }
 0x10d   :  { %v112_v19 = vadd.f32 %v111_v17, %v110_v15  ;;  %v118_v20 = vrot.slane %v117_v18, 1 }
 0x10f   :  { %v119_v21 = vadd.f32 %v118_v20, %v117_v18  ;;  %v120_v22 = vmul.f32 0.125, %v112_v19 }
 0x111   :  { %v121_v23 = vmul.f32 0.125, %v119_v21  ;;  %v122_v24 = vmul.f32 %v120_v22, %v120_v22 }
 0x113   :  { %v123_v25 = vsub.f32 %v121_v23, %v122_v24 }
 0x115   :  { %v124_v26 = vmax.f32 %v123_v25, 0.0 }
 0x117   :  { %v126_v27 = vadd.f32 1e-05, %v124_v26 }
 0x119   :  { %189 = vrsqrt.f32 %v126_v27 }
 0x123   :  { %v190_v32 = vpop.eup %189 }
 0x124   :  { %v128_v33 = vmul.f32 %v190_v32, %v125_v30 }
 0x126   :  { %v130_v35 = vmul.f32 %v128_v33, %v120_v22  ;;  %v136_v36 = vrot.slane %v128_v33, %v135_v31 }
 0x128   :  { %v131_v37 = vsub.f32 %v129_v34, %v130_v35  ;;  %v138_v38 = vmul.f32 %v136_v36, %v101_v5 }
 0x12a   :  { %v143_v39 = vrot.slane %v131_v37, %v135_v31 }
 0x12c   :  { %v145_v40 = vadd.f32 %v143_v39, %v138_v38 }
 0x12e   :  { %vm146_vm2 = vcmp.ge.f32.partialorder %v145_v40, 0.0  ;;  %v147_v41 = vmul.f32 0.15, %v145_v40 }
 0x130   :  { %v148_v42 = vsel %vm146_vm2, %v145_v40, %v147_v41 }
 0x131   :  { %149 = vst [vmem:[#allocation7] sm:$0xff] %v148_v42 }
 0x132   :  { %246 = shalt.err (!%p243_p6)
}
 0x133   :  { %s247_s20 = scalar_lea.hbm %s348_s4, 128 }
 0x134   :  { %p248_p7 = scmp.ne.s32.totalorder %s348_s4, %s247_s20  ;;  %p251_p8 = scmp.lt.u32.totalorder %s247_s20, %s348_s4 }
 0x136   :  { %p253_p9 = pnand %p251_p8, %p248_p7 }
 0x138   :  { %256 = shalt.err (!%p253_p9)
}
 0x139   :  { %159 = dma.vmem_to_hbm [thread:$0]  %s157_s18, 128, %s348_s4, [#allocation4]  }
 0x13a   :  { %261 = dma.done.wait [#allocation4], 128  }
 0x13b   :  { %262 = vsyncadd [#allocation4], 4294967168 }
 0x13c   :  { %163 = vsyncpa [#allocation3], 1 }
 0x13d   :  { %164 = vsyncpa [#allocation6], 1 }
 0x13e   :  { %165 = vsyncpa [#allocation4], 1 }

</bundles_post_ra>
